<compile_context>
chip_gen: v6e
topology: v6e:2x2x1
jax: 0.10.0
libtpu: 0.0.40
codegen_flags: <defaults>
</compile_context>

<pallas_src>
import jax
import jax.numpy as jnp
from jax.experimental import pallas as pl
from jax.experimental.pallas import tpu as pltpu

_LANE = 128  # vreg lane width


def _add_cloak_kernel(x_ref, cloak_ref, o_ref):
    # Pure element-wise VPU add on one (1, TR, 128) tile.
    o_ref[...] = (x_ref[...] + cloak_ref[...]).astype(o_ref.dtype)


def _vmem_capacity_bytes():
    """Trace-time VMEM capacity query; conservative (v7x-sized) fallback."""
    try:
        cap = getattr(pltpu.get_tpu_info(), "vmem_capacity_bytes", None)
        if cap:
            return int(cap)
    except Exception:
        pass
    return 64 * 1024 * 1024


def _pick_tiling(itemsize):
    """Row-tile target + scoped-VMEM cap per TPU generation and dtype."""
    vmem = _vmem_capacity_bytes()
    if vmem >= 128 * 1024 * 1024:
        base_tr = 16384            # 8 MiB per f32 buffer (v5e/v6e, 128 MiB VMEM)
        vmem_limit = 96 * 1024 * 1024
    else:
        base_tr = 9216             # 4.5 MiB per f32 buffer; 73728/9216 = 8 even
                                   # tiles at the real size -> balanced v7x 2-TC split
        vmem_limit = 40 * 1024 * 1024
    # Dtype scaling keeps bytes/step constant (f32 x1, bf16 x2, int8/fp8 x4).
    # Base TRs are multiples of 32 so the result satisfies every sublane pack
    # (8 for f32, 16 for bf16, 32 for 1-byte dtypes).
    tr = base_tr * max(1, 4 // itemsize)
    return tr, vmem_limit


def cloak_forward(x, cloak, *, donate_x=False):
    """x: (B, 3, *image_size); cloak: (1, 3, *image_size). Returns x + cloak."""
    assert cloak.shape[0] == 1 and x.shape[1:] == cloak.shape[1:], (x.shape, cloak.shape)
    B = x.shape[0]
    n = 1
    for d in x.shape[1:]:
        n *= d
    itemsize = jnp.dtype(x.dtype).itemsize
    tr_target, vmem_limit = _pick_tiling(itemsize)

    rows = pl.cdiv(n, _LANE)
    n_lane = rows * _LANE

    x_flat = x.reshape(B, n)
    c_flat = cloak.reshape(1, n)
    if n_lane != n:
        # Rare path (never hit at 3x3x1024x1024 or any 128-aligned size): pad
        # only to the next lane multiple so the (B, rows, 128) reshape stays a
        # zero-copy contiguous reshape.  There is NO padding to a tile multiple
        # anymore -- the ragged last row tile is masked by Pallas instead.
        # TODO(synk): a fully pad-free lane-ragged tail would need a 2-level
        # in-kernel masked store; not worth it for a <128-element pad.
        x_flat = jnp.pad(x_flat, ((0, 0), (0, n_lane - n)))
        c_flat = jnp.pad(c_flat, ((0, 0), (0, n_lane - n)))
    x3 = x_flat.reshape(B, rows, _LANE)      # contiguous reshape: no HBM copy
    c3 = c_flat.reshape(1, rows, _LANE)

    if rows <= tr_target:
        # Single row tile covering the *full* rows dim.  This is exempt from
        # the 8-sublane divisibility rule only because the block equals the
        # array dim -- keep this coupling if the tile selection changes.
        tr = rows
    else:
        tr = tr_target                        # multiple of the sublane pack
    num_row_tiles = pl.cdiv(rows, tr)         # ragged last tile masked by Pallas

    out = pl.pallas_call(
        _add_cloak_kernel,
        out_shape=jax.ShapeDtypeStruct((B, rows, _LANE), x.dtype),
        # Batch innermost (fastest-varying): the cloak block index depends only
        # on r, so Pallas skips its DMA across consecutive batch steps and the
        # cloak is fetched once per row tile instead of once per (tile, example).
        grid=(num_row_tiles, B),
        in_specs=[
            pl.BlockSpec((1, tr, _LANE), lambda r, b: (b, r, 0)),   # x
            pl.BlockSpec((1, tr, _LANE), lambda r, b: (0, r, 0)),   # cloak (batch-bcast)
            # TODO(synk): on v7x, pipeline_mode=pl.Buffered(1) on the cloak spec
            # would free one buffer of VMEM; not needed at the current budget.
        ],
        out_specs=pl.BlockSpec((1, tr, _LANE), lambda r, b: (b, r, 0)),
        compiler_params=pltpu.CompilerParams(
            # Rows sharded across TensorCores (v7x megacore); batch marked
            # "arbitrary" so it stays the inner serial loop per core and the
            # cloak-reuse / (2B+1)*n traffic claim holds under sharding.
            dimension_semantics=("parallel", "arbitrary"),
            vmem_limit_bytes=vmem_limit,
        ),
        # Advisory hint so XLA schedules neighbors around this mem-bound call.
        cost_estimate=pl.CostEstimate(
            flops=B * n,
            transcendentals=0,
            bytes_accessed=(2 * B + 1) * n * itemsize,
        ),
        # Donating x halves the HBM footprint (B x 36 MiB at the real size) when
        # the caller donates x upstream; off by default so un-donated callers
        # don't pay a defensive copy.
        input_output_aliases={0: 0} if donate_x else {},
    )(x3, c3)

    if n_lane != n:
        out = out.reshape(B, n_lane)[:, :n]
    return out.reshape(x.shape)


if __name__ == "__main__":
    # Small shapes: image_size=(3,16,16) mirrors the module's (3,1024,1024)
    # structure, so the parameter is zeros(1, 3, 3, 16, 16) exactly like
    # nn.Parameter(torch.zeros(1, 3, *image_size)).
    image_size = (3, 16, 16)
    batch = 2

    key = jax.random.PRNGKey(0)
    x = jax.random.normal(key, (batch, 3) + image_size, dtype=jnp.float32)

    # Deterministic parameter init, identical to the PyTorch module (zeros).
    cloak = jnp.zeros((1, 3) + image_size, dtype=jnp.float32)

    out = jax.block_until_ready(cloak_forward(x, cloak))

    ref = x + cloak  # reference broadcast add
    assert out.shape == ref.shape, (out.shape, ref.shape)
    assert jnp.allclose(out, ref, atol=0.0, rtol=0.0)

    print("KERNEL_OK")
</pallas_src>

<mosaic_0001>
module attributes {stable_mosaic.version = 11 : i64} {
  func.func @_add_cloak_kernel(%arg0: i32, %arg1: i32, %arg2: memref<1x18x128xf32, #tpu.memory_space<vmem>>, %arg3: memref<1x18x128xf32, #tpu.memory_space<vmem>>, %arg4: memref<1x18x128xf32, #tpu.memory_space<vmem>>) attributes {dimension_semantics = [#tpu.dimension_semantics<parallel>, #tpu.dimension_semantics<arbitrary>], iteration_bounds = array<i64: 1, 2>, scalar_prefetch = 0 : i64, scratch_operands = 0 : i64, tpu.core_type = #tpu.core_type<tc>, window_params = [{transform_indices = @transform_0, window_bounds = array<i64: 1, 18, 128>}, {transform_indices = @transform_1, window_bounds = array<i64: 1, 18, 128>}, {transform_indices = @transform_2, window_bounds = array<i64: 1, 18, 128>}]} {
    %c0 = arith.constant 0 : index
    %c0_0 = arith.constant 0 : index
    %c0_1 = arith.constant 0 : index
    %0 = vector.load %arg2[%c0, %c0_0, %c0_1] : memref<1x18x128xf32, #tpu.memory_space<vmem>>, vector<1x18x128xf32>
    %c0_2 = arith.constant 0 : index
    %c0_3 = arith.constant 0 : index
    %c0_4 = arith.constant 0 : index
    %1 = vector.load %arg3[%c0_2, %c0_3, %c0_4] : memref<1x18x128xf32, #tpu.memory_space<vmem>>, vector<1x18x128xf32>
    %2 = arith.addf %0, %1 : vector<1x18x128xf32>
    %c0_5 = arith.constant 0 : index
    %c0_6 = arith.constant 0 : index
    %c0_7 = arith.constant 0 : index
    %3 = vector.load %arg4[%c0_5, %c0_6, %c0_7] : memref<1x18x128xf32, #tpu.memory_space<vmem>>, vector<1x18x128xf32>
    tpu.vector_store %arg4[%c0_5, %c0_6, %c0_7], %2 {strides = array<i32>} : memref<1x18x128xf32, #tpu.memory_space<vmem>>, vector<1x18x128xf32>,
    return
  }
  func.func @transform_0(%arg0: i32, %arg1: i32) -> (i32, i32, i32) {
    %c0_i32 = arith.constant 0 : i32
    %c0_i32_0 = arith.constant 0 : i32
    return %arg1, %arg0, %c0_i32 : i32, i32, i32
  }
  func.func @transform_1(%arg0: i32, %arg1: i32) -> (i32, i32, i32) {
    %c0_i32 = arith.constant 0 : i32
    %c0_i32_0 = arith.constant 0 : i32
    %c0_i32_1 = arith.constant 0 : i32
    return %c0_i32, %arg0, %c0_i32_0 : i32, i32, i32
  }
  func.func @transform_2(%arg0: i32, %arg1: i32) -> (i32, i32, i32) {
    %c0_i32 = arith.constant 0 : i32
    %c0_i32_0 = arith.constant 0 : i32
    return %arg1, %arg0, %c0_i32 : i32, i32, i32
  }
}

</mosaic_0001>

<bundles_post_ra>
// kernel: tpu_custom_call.1
= control target key start
LH: loop header
LB: loop body
LE: loop exit
PB: predicated region body
PF: predicated region fallthrough
CT: control target
= control target key end

     0   :  { %s393_s9 = smov 0   ;;  %s395_s10 = smov 0   ;;  %s428_s0 = inlined_call_operand.vmem [shape: f32[2,18,128], index: 0, kind: input, shape index: {}]   ;;  %s429_s1 = inlined_call_operand.vmem [shape: f32[1,18,128], index: 1, kind: input, shape index: {}]   ;;  %s430_s2 = inlined_call_operand.vmem [shape: f32[2,18,128], index: 2, kind: output, shape index: {}]  }
   0x1   :  { %s397_s11 = smov 0  }
   0x2 LB: > { %s21_s12 = sadd.s32 1, %s372_s10  ;;  %p324_p0 = scmp.ge.s32.totalorder %s376_s11, 1  ;;  %s376_s11 = sphi %s397_s11, %s12_s11   ;;  %s372_s10 = sphi %s395_s10, %s432_s10   ;;  %s368_s9 = sphi %s393_s9, %s431_s9  }
   0x3   : > { %p22_p1 = scmp.ge.s32.totalorder %s21_s12, 2  ;;  %p144_p2 = scmp.lt.s32.totalorder %s376_s11, 3 }
   0x5   : > { %s434_s12 = smov (%p22_p1, %s21_s12), 0  ;;  %p145_p3 = pnand %p324_p0, %p144_p2 }
   0x6   : > { %p180_p4 = scmp.lt.s32.totalorder (!%p145_p3), %s368_s9, 1 }
   0x7   : > { %148 = sbr.rel (%p145_p3) target bundleno = 21 (0x15), region = 28 }
   0xc   : > { %s436_s9 = smov (!%p180_p4, %s368_s9), 1  ;;  %v208_v0 = vld [vmem:[%s429_s1] sm:$0xff]  ;;  %v209_v1 = vld [vmem:[%s429_s1 + $0x8] sm:$0xff]  ;;  %v210_v2 = vld [vmem:[%s429_s1 + $0x10] sm:$0x3] }
   0xd   : > { %s329_s13 = smul.u32 24, %s436_s9 }
   0xf   : > { %s187_s22 = scalar_lea.vmem %s428_s0, %s329_s13  ;;  %s203_s25 = scalar_lea.vmem %s430_s2, %s329_s13 }
  0x10   : > { %v205_v3 = vld [vmem:[%s187_s22] sm:$0xff]  ;;  %v206_v4 = vld [vmem:[%s187_s22 + $0x8] sm:$0xff]  ;;  %v207_v5 = vld [vmem:[%s187_s22 + $0x10] sm:$0x3] }
  0x11   : > { %v211_v6 = vadd.f32 %v208_v0, %v205_v3  ;;  %v212_v7 = vadd.f32 %v209_v1, %v206_v4  ;;  %v213_v8 = vadd.f32 %v210_v2, %v207_v5 }
  0x13   : > { %214 = vst [vmem:[%s203_s25] sm:$0xff] %v211_v6  ;;  %215 = vst [vmem:[%s203_s25 + $0x8] sm:$0xff] %v212_v7 }
  0x14   : > { %216 = vst [vmem:[%s203_s25 + $0x10] sm:$0x3] %v213_v8 }
  0x15 PF: > { %s12_s11 = sadd.s32 1, %s376_s11   ;;  %s431_s9 = smov %s372_s10 }
  0x16   : > { %p9_p5 = scmp.ge.s32.totalorder %s12_s11, 4   ;;  %s432_s10 = smov %s434_s12 }
  0x18   :  { %11 = sbr.rel (!%p9_p5) target bundleno = 2 (0x2), region = 61 }

</bundles_post_ra>
